<compile_context>
chip_gen: v7x
topology: tpu7x:2x2x1
jax: 0.10.0
libtpu: 0.0.40
codegen_flags: <defaults>
</compile_context>

<pallas_src>
import jax
import jax.numpy as jnp
from jax.experimental import pallas as pl
from jax.experimental.pallas import tpu as pltpu


def _leaky_relu(v, slope=0.2):
    return jnp.where(v > 0, v, slope * v)


def _round_up(n, m):
    return ((n + m - 1) // m) * m


def _physical_vmem_bytes():
    try:
        info = pltpu.get_tpu_info()
        return int(getattr(info, "vmem_capacity_bytes", 128 * 1024 * 1024))
    except Exception:
        return 128 * 1024 * 1024


def globalnet_kernel(x_ref,
                     w0_ref, b0_ref,
                     w1_ref, b1_ref,
                     w2_ref, b2_ref,
                     w3_ref, b3_ref,
                     out_ref):
    """Fused forward pass for one tile of rows.

    x_ref   : (TM, F)    activations, fp32 straight from HBM
    w*_ref  : weights as (in, out) in the compute dtype; w3 as a (1, 128) row
    b*_ref  : biases as (1, out) fp32; b3 as (1, 1)
    out_ref : (1, 1, TM) lane-dense sigmoid scores for this tile
    """
    cdt = w0_ref.dtype
    # Cast fp32 -> compute dtype on the VPU (free slack under MXU-bound work).
    x = x_ref[...].astype(cdt)

    # adaptor: Linear(F, F) + LeakyReLU(0.2)
    h = jnp.dot(x, w0_ref[...], preferred_element_type=jnp.float32) + b0_ref[...]
    h = _leaky_relu(h).astype(cdt)

    # discriminator layer 1: Linear(F, 1024) + LeakyReLU(0.2)
    h = jnp.dot(h, w1_ref[...], preferred_element_type=jnp.float32) + b1_ref[...]
    h = _leaky_relu(h).astype(cdt)

    # discriminator layer 2: Linear(1024, 128) + LeakyReLU(0.2)
    h = jnp.dot(h, w2_ref[...], preferred_element_type=jnp.float32) + b2_ref[...]
    h = _leaky_relu(h).astype(cdt)                            # (TM, 128) cdt

    # discriminator layer 3: Linear(128, 1) + Sigmoid.
    # Contract the 128-wide feature dim of BOTH operands so the per-row scores
    # come out lane-dense as (1, TM) -- avoids a (TM, 1) column result and the
    # masked single-lane stores it would cause.  fp32 accumulation on the MXU.
    s = jax.lax.dot_general(
        w3_ref[...], h, (((1,), (1,)), ((), ())),
        preferred_element_type=jnp.float32) + b3_ref[...]     # (1, TM)
    out_ref[0] = jax.nn.sigmoid(s)


def globalnet_forward(x, params, *, tile_rows=None, compute_dtype=jnp.bfloat16):
    """x: (B, T, F) float32. Returns global_score.squeeze() -> (B, T)."""
    B, T, F = x.shape
    N = B * T

    (w0, b0), (w1, b1), (w2, b2), (w3, b3) = params
    F1, F2 = w1.shape[1], w2.shape[1]                         # 1024, 128

    phys_vmem = _physical_vmem_bytes()
    # Per-generation default row tile: 1024 on 128 MiB VMEM (v5e/v6e),
    # 512 on 64 MiB VMEM (v7x).
    if tile_rows is None:
        tile_rows = 1024 if phys_vmem >= (96 << 20) else 512

    cds = jnp.dtype(compute_dtype).itemsize
    row_align = 16 if cds == 2 else 8                         # bf16 packs 16 rows/vreg
    TM = min(_round_up(tile_rows, row_align), _round_up(N, row_align))
    # Megacore-aware sizing: keep >= 2 grid steps when possible so
    # dimension_semantics=("parallel",) can shard across both TCs on v7x.
    if N > 2 * row_align:
        TM = min(TM, _round_up(pl.cdiv(N, 2), row_align))
    G = pl.cdiv(N, TM)            # ragged last block handled by Pallas

    x2 = x.reshape(N, F)          # stays fp32; cast happens inside the kernel
    w0c = w0.astype(compute_dtype)
    w1c = w1.astype(compute_dtype)
    w2c = w2.astype(compute_dtype)
    w3r = w3.reshape(1, F2).astype(compute_dtype)             # (1, 128) row
    b0c = b0.astype(jnp.float32)
    b1c = b1.astype(jnp.float32)
    b2c = b2.astype(jnp.float32)
    b3c = b3.reshape(1, 1).astype(jnp.float32)

    def row_map(i):
        return (i, 0)

    def fixed_map(i):
        return (0, 0)

    # Constant index_map => weights are resident across the whole grid; a
    # single buffer is enough (Buffered(2) would only duplicate them in VMEM).
    resident = pl.Buffered(1)

    def w_spec(shape):
        return pl.BlockSpec(shape, fixed_map, pipeline_mode=resident)

    # VMEM budget: single-buffered resident weights + double-buffered fp32 x
    # tile / fp32 out tile + fp32/compute-dtype intermediates, clamped to ~85%
    # of physical VMEM (v7x only has 64 MiB per TensorCore).
    weight_bytes = ((w0c.size + w1c.size + w2c.size + w3r.size) * cds
                    + (b0c.size + b1c.size + b2c.size + b3c.size) * 4)
    tile_bytes = 2 * TM * F * 4 + 2 * TM * 4
    interm_bytes = TM * (F + F1 + F2) * (4 + cds)
    vmem_limit = max(32 << 20,
                     weight_bytes + tile_bytes + interm_bytes + (4 << 20))
    vmem_limit = int(min(vmem_limit, int(0.85 * phys_vmem)))

    flops = 2 * N * (F * F + F * F1 + F1 * F2 + F2)
    bytes_accessed = int(N * F * 4 + weight_bytes + G * TM * 4)

    out_slab = pl.pallas_call(
        globalnet_kernel,
        out_shape=jax.ShapeDtypeStruct((G, 1, TM), jnp.float32),
        grid_spec=pltpu.PrefetchScalarGridSpec(
            num_scalar_prefetch=0,
            grid=(G,),
            in_specs=[
                pl.BlockSpec((TM, F), row_map),   # x tile (fp32, dbl-buffered)
                w_spec((F, F)),                   # w0  (resident, 1 buffer)
                w_spec((1, F)),                   # b0
                w_spec((F, F1)),                  # w1
                w_spec((1, F1)),                  # b1
                w_spec((F1, F2)),                 # w2
                w_spec((1, F2)),                  # b2
                w_spec((1, F2)),                  # w3 row
                w_spec((1, 1)),                   # b3
            ],
            out_specs=pl.BlockSpec((1, 1, TM), lambda i: (i, 0, 0)),
        ),
        compiler_params=pltpu.CompilerParams(
            dimension_semantics=("parallel",),
            vmem_limit_bytes=vmem_limit),
        cost_estimate=pl.CostEstimate(
            flops=int(flops),
            transcendentals=int(N),
            bytes_accessed=bytes_accessed),
    )(x2, w0c, b0c, w1c, b1c, w2c, b2c, w3r, b3c)

    out = out_slab.reshape(G * TM)[:N]    # drop ragged tail padding
    # torch .squeeze(): for (B, T, F) input the score (B, T, 1) squeezes to (B, T).
    return out.reshape(B, T)


def init_params(key, len_feature):
    """Deterministic init mimicking the PyTorch module's layer shapes.

    Weights are stored as (in_features, out_features) (i.e. torch W^T).
    """
    dims = [(len_feature, len_feature),
            (len_feature, 1024),
            (1024, 128),
            (128, 1)]
    params = []
    for d_in, d_out in dims:
        key, kw, kb = jax.random.split(key, 3)
        bound = 1.0 / jnp.sqrt(d_in)
        w = jax.random.uniform(kw, (d_in, d_out), jnp.float32, -bound, bound)
        b = jax.random.uniform(kb, (1, d_out), jnp.float32, -bound, bound)
        params.append((w, b))
    return params


def reference_forward(x, params):
    """Pure-JAX fp32 reference for correctness check."""
    B, T, F = x.shape
    h = x.reshape(B * T, F)
    (w0, b0), (w1, b1), (w2, b2), (w3, b3) = params
    h = _leaky_relu(h @ w0 + b0)
    h = _leaky_relu(h @ w1 + b1)
    h = _leaky_relu(h @ w2 + b2)
    s = jax.nn.sigmoid(h @ w3 + b3)
    return s[:, 0].reshape(B, T)


if __name__ == "__main__":
    key = jax.random.PRNGKey(0)
    k_x, k_p = jax.random.split(key)

    B, T, LEN_FEATURE = 2, 8, 32
    x = jax.random.normal(k_x, (B, T, LEN_FEATURE), dtype=jnp.float32)
    params = init_params(k_p, LEN_FEATURE)

    ref = reference_forward(x, params)

    # fp32 compute path: matches the reference tightly.
    out_f32 = jax.block_until_ready(
        globalnet_forward(x, params, compute_dtype=jnp.float32))
    assert out_f32.shape == (B, T), out_f32.shape
    assert jnp.allclose(out_f32, ref, atol=1e-4, rtol=1e-4), (
        float(jnp.max(jnp.abs(out_f32 - ref))))

    # bf16 compute path (default, MXU-friendly): matches within bf16 precision.
    out_bf16 = jax.block_until_ready(globalnet_forward(x, params))
    assert out_bf16.shape == (B, T), out_bf16.shape
    assert jnp.allclose(out_bf16, ref, atol=2e-2, rtol=0.0), (
        float(jnp.max(jnp.abs(out_bf16 - ref))))

    print("KERNEL_OK")
</pallas_src>

<mosaic_0001>
module attributes {stable_mosaic.version = 11 : i64} {
  func.func @globalnet_kernel(%arg0: i32, %arg1: memref<16x32xf32, #tpu.memory_space<vmem>>, %arg2: memref<32x32xf32, #tpu.memory_space<vmem>>, %arg3: memref<1x32xf32, #tpu.memory_space<vmem>>, %arg4: memref<32x1024xf32, #tpu.memory_space<vmem>>, %arg5: memref<1x1024xf32, #tpu.memory_space<vmem>>, %arg6: memref<1024x128xf32, #tpu.memory_space<vmem>>, %arg7: memref<1x128xf32, #tpu.memory_space<vmem>>, %arg8: memref<1x128xf32, #tpu.memory_space<vmem>>, %arg9: memref<1x1xf32, #tpu.memory_space<vmem>>, %arg10: memref<1x1x16xf32, #tpu.memory_space<vmem>>) attributes {dimension_semantics = [#tpu.dimension_semantics<parallel>], iteration_bounds = array<i64: 1>, scalar_prefetch = 0 : i64, scratch_operands = 0 : i64, tpu.core_type = #tpu.core_type<tc>, window_params = [{transform_indices = @transform_0, window_bounds = array<i64: 16, 32>}, {pipeline_mode = #tpu.pipeline_mode<synchronous>, transform_indices = @transform_1, window_bounds = array<i64: 32, 32>}, {pipeline_mode = #tpu.pipeline_mode<synchronous>, transform_indices = @transform_2, window_bounds = array<i64: 1, 32>}, {pipeline_mode = #tpu.pipeline_mode<synchronous>, transform_indices = @transform_3, window_bounds = array<i64: 32, 1024>}, {pipeline_mode = #tpu.pipeline_mode<synchronous>, transform_indices = @transform_4, window_bounds = array<i64: 1, 1024>}, {pipeline_mode = #tpu.pipeline_mode<synchronous>, transform_indices = @transform_5, window_bounds = array<i64: 1024, 128>}, {pipeline_mode = #tpu.pipeline_mode<synchronous>, transform_indices = @transform_6, window_bounds = array<i64: 1, 128>}, {pipeline_mode = #tpu.pipeline_mode<synchronous>, transform_indices = @transform_7, window_bounds = array<i64: 1, 128>}, {pipeline_mode = #tpu.pipeline_mode<synchronous>, transform_indices = @transform_8, window_bounds = array<i64: 1, 1>}, {transform_indices = @transform_9, window_bounds = array<i64: 1, 1, 16>}]} {
    %c0 = arith.constant 0 : index
    %c0_0 = arith.constant 0 : index
    %0 = vector.load %arg1[%c0, %c0_0] : memref<16x32xf32, #tpu.memory_space<vmem>>, vector<16x32xf32>
    %c0_1 = arith.constant 0 : index
    %c0_2 = arith.constant 0 : index
    %1 = vector.load %arg2[%c0_1, %c0_2] : memref<32x32xf32, #tpu.memory_space<vmem>>, vector<32x32xf32>
    %cst = arith.constant dense<0.000000e+00> : vector<16x32xf32>
    %2 = tpu.matmul %0, %1, %cst {dimension_numbers = #tpu.dot_dimension_numbers<[1], [0], [0], [1], [0, 0, 1, 1], [], []>} : vector<16x32xf32>, vector<32x32xf32>, vector<16x32xf32> -> vector<16x32xf32>
    %c0_3 = arith.constant 0 : index
    %c0_4 = arith.constant 0 : index
    %3 = vector.load %arg3[%c0_3, %c0_4] : memref<1x32xf32, #tpu.memory_space<vmem>>, vector<1x32xf32>
    %4 = vector.broadcast %3 : vector<1x32xf32> to vector<16x32xf32>
    %5 = arith.addf %2, %4 : vector<16x32xf32>
    %cst_5 = arith.constant 0.000000e+00 : f32
    %6 = vector.broadcast %cst_5 : f32 to vector<16x32xf32>
    %7 = arith.cmpf ogt, %5, %6 : vector<16x32xf32>
    %cst_6 = arith.constant 2.000000e-01 : f32
    %8 = vector.broadcast %cst_6 : f32 to vector<16x32xf32>
    %9 = arith.mulf %8, %5 : vector<16x32xf32>
    %10 = arith.select %7, %5, %9 : vector<16x32xi1>, vector<16x32xf32>
    %c0_7 = arith.constant 0 : index
    %c0_8 = arith.constant 0 : index
    %11 = vector.load %arg4[%c0_7, %c0_8] : memref<32x1024xf32, #tpu.memory_space<vmem>>, vector<32x1024xf32>
    %cst_9 = arith.constant dense<0.000000e+00> : vector<16x1024xf32>
    %12 = tpu.matmul %10, %11, %cst_9 {dimension_numbers = #tpu.dot_dimension_numbers<[1], [0], [0], [1], [0, 0, 1, 1], [], []>} : vector<16x32xf32>, vector<32x1024xf32>, vector<16x1024xf32> -> vector<16x1024xf32>
    %c0_10 = arith.constant 0 : index
    %c0_11 = arith.constant 0 : index
    %13 = vector.load %arg5[%c0_10, %c0_11] : memref<1x1024xf32, #tpu.memory_space<vmem>>, vector<1x1024xf32>
    %14 = vector.broadcast %13 : vector<1x1024xf32> to vector<16x1024xf32>
    %15 = arith.addf %12, %14 : vector<16x1024xf32>
    %cst_12 = arith.constant 0.000000e+00 : f32
    %16 = vector.broadcast %cst_12 : f32 to vector<16x1024xf32>
    %17 = arith.cmpf ogt, %15, %16 : vector<16x1024xf32>
    %cst_13 = arith.constant 2.000000e-01 : f32
    %18 = vector.broadcast %cst_13 : f32 to vector<16x1024xf32>
    %19 = arith.mulf %18, %15 : vector<16x1024xf32>
    %20 = arith.select %17, %15, %19 : vector<16x1024xi1>, vector<16x1024xf32>
    %c0_14 = arith.constant 0 : index
    %c0_15 = arith.constant 0 : index
    %21 = vector.load %arg6[%c0_14, %c0_15] : memref<1024x128xf32, #tpu.memory_space<vmem>>, vector<1024x128xf32>
    %cst_16 = arith.constant dense<0.000000e+00> : vector<16x128xf32>
    %22 = tpu.matmul %20, %21, %cst_16 {dimension_numbers = #tpu.dot_dimension_numbers<[1], [0], [0], [1], [0, 0, 1, 1], [], []>} : vector<16x1024xf32>, vector<1024x128xf32>, vector<16x128xf32> -> vector<16x128xf32>
    %c0_17 = arith.constant 0 : index
    %c0_18 = arith.constant 0 : index
    %23 = vector.load %arg7[%c0_17, %c0_18] : memref<1x128xf32, #tpu.memory_space<vmem>>, vector<1x128xf32>
    %24 = vector.broadcast %23 : vector<1x128xf32> to vector<16x128xf32>
    %25 = arith.addf %22, %24 : vector<16x128xf32>
    %cst_19 = arith.constant 0.000000e+00 : f32
    %26 = vector.broadcast %cst_19 : f32 to vector<16x128xf32>
    %27 = arith.cmpf ogt, %25, %26 : vector<16x128xf32>
    %cst_20 = arith.constant 2.000000e-01 : f32
    %28 = vector.broadcast %cst_20 : f32 to vector<16x128xf32>
    %29 = arith.mulf %28, %25 : vector<16x128xf32>
    %30 = arith.select %27, %25, %29 : vector<16x128xi1>, vector<16x128xf32>
    %c0_21 = arith.constant 0 : index
    %c0_22 = arith.constant 0 : index
    %31 = vector.load %arg8[%c0_21, %c0_22] : memref<1x128xf32, #tpu.memory_space<vmem>>, vector<1x128xf32>
    %cst_23 = arith.constant dense<0.000000e+00> : vector<1x16xf32>
    %32 = tpu.matmul %31, %30, %cst_23 {dimension_numbers = #tpu.dot_dimension_numbers<[1], [1], [0], [0], [0, 0, 1, 0], [], []>} : vector<1x128xf32>, vector<16x128xf32>, vector<1x16xf32> -> vector<1x16xf32>
    %c0_24 = arith.constant 0 : index
    %c0_25 = arith.constant 0 : index
    %33 = vector.load %arg9[%c0_24, %c0_25] : memref<1x1xf32, #tpu.memory_space<vmem>>, vector<1x1xf32>
    %34 = vector.broadcast %33 : vector<1x1xf32> to vector<1x16xf32>
    %35 = arith.addf %32, %34 : vector<1x16xf32>
    %36 = arith.negf %35 : vector<1x16xf32>
    %37 = math.exp %36 : vector<1x16xf32>
    %cst_26 = arith.constant 1.000000e+00 : f32
    %38 = vector.broadcast %cst_26 : f32 to vector<1x16xf32>
    %39 = arith.addf %38, %37 : vector<1x16xf32>
    %40 = arith.divf %38, %39 : vector<1x16xf32>
    %c0_27 = arith.constant 0 : index
    %c0_28 = arith.constant 0 : index
    %c0_29 = arith.constant 0 : index
    %41 = vector.load %arg10[%c0_27, %c0_28, %c0_29] : memref<1x1x16xf32, #tpu.memory_space<vmem>>, vector<1x1x16xf32>
    %42 = vector.shape_cast %41 : vector<1x1x16xf32> to vector<1x16xf32>
    %43 = vector.shape_cast %40 : vector<1x16xf32> to vector<1x1x16xf32>
    tpu.vector_store %arg10[%c0_27, %c0_28, %c0_29], %43 {strides = array<i32>} : memref<1x1x16xf32, #tpu.memory_space<vmem>>, vector<1x1x16xf32>,
    return
  }
  func.func @transform_0(%arg0: i32) -> (i32, i32) {
    %c0_i32 = arith.constant 0 : i32
    %c0_i32_0 = arith.constant 0 : i32
    return %arg0, %c0_i32 : i32, i32
  }
  func.func @transform_1(%arg0: i32) -> (i32, i32) {
    %c0_i32 = arith.constant 0 : i32
    %c0_i32_0 = arith.constant 0 : i32
    %c0_i32_1 = arith.constant 0 : i32
    return %c0_i32, %c0_i32_0 : i32, i32
  }
  func.func @transform_2(%arg0: i32) -> (i32, i32) {
    %c0_i32 = arith.constant 0 : i32
    %c0_i32_0 = arith.constant 0 : i32
    %c0_i32_1 = arith.constant 0 : i32
    return %c0_i32, %c0_i32_0 : i32, i32
  }
  func.func @transform_3(%arg0: i32) -> (i32, i32) {
    %c0_i32 = arith.constant 0 : i32
    %c0_i32_0 = arith.constant 0 : i32
    %c0_i32_1 = arith.constant 0 : i32
    return %c0_i32, %c0_i32_0 : i32, i32
  }
  func.func @transform_4(%arg0: i32) -> (i32, i32) {
    %c0_i32 = arith.constant 0 : i32
    %c0_i32_0 = arith.constant 0 : i32
    %c0_i32_1 = arith.constant 0 : i32
    return %c0_i32, %c0_i32_0 : i32, i32
  }
  func.func @transform_5(%arg0: i32) -> (i32, i32) {
    %c0_i32 = arith.constant 0 : i32
    %c0_i32_0 = arith.constant 0 : i32
    %c0_i32_1 = arith.constant 0 : i32
    return %c0_i32, %c0_i32_0 : i32, i32
  }
  func.func @transform_6(%arg0: i32) -> (i32, i32) {
    %c0_i32 = arith.constant 0 : i32
    %c0_i32_0 = arith.constant 0 : i32
    %c0_i32_1 = arith.constant 0 : i32
    return %c0_i32, %c0_i32_0 : i32, i32
  }
  func.func @transform_7(%arg0: i32) -> (i32, i32) {
    %c0_i32 = arith.constant 0 : i32
    %c0_i32_0 = arith.constant 0 : i32
    %c0_i32_1 = arith.constant 0 : i32
    return %c0_i32, %c0_i32_0 : i32, i32
  }
  func.func @transform_8(%arg0: i32) -> (i32, i32) {
    %c0_i32 = arith.constant 0 : i32
    %c0_i32_0 = arith.constant 0 : i32
    %c0_i32_1 = arith.constant 0 : i32
    return %c0_i32, %c0_i32_0 : i32, i32
  }
  func.func @transform_9(%arg0: i32) -> (i32, i32, i32) {
    %c0_i32 = arith.constant 0 : i32
    %c0_i32_0 = arith.constant 0 : i32
    %c0_i32_1 = arith.constant 0 : i32
    return %arg0, %c0_i32, %c0_i32_0 : i32, i32, i32
  }
}

</mosaic_0001>

<bundles_post_ra>
// kernel: tpu_custom_call.1
= control target key start
LH: loop header
LB: loop body
LE: loop exit
PB: predicated region body
PF: predicated region fallthrough
CT: control target
= control target key end

     0   :  { %s1927_s0 = inlined_call_operand.hbm [shape: f32[16,32], index: 0, kind: input, shape index: {}]   ;;  %s1928_s1 = inlined_call_operand.hbm [shape: f32[32,32], index: 1, kind: input, shape index: {}]   ;;  %s1929_s2 = inlined_call_operand.vmem [shape: f32[1,32], index: 2, kind: input, shape index: {}]   ;;  %s1930_s3 = inlined_call_operand.hbm [shape: f32[32,1024], index: 3, kind: input, shape index: {}]   ;;  %s1931_s4 = inlined_call_operand.vmem [shape: f32[1,1024], index: 4, kind: input, shape index: {}]   ;;  %s1932_s5 = inlined_call_operand.hbm [shape: f32[1024,128], index: 5, kind: input, shape index: {}]   ;;  %s1933_s6 = inlined_call_operand.vmem [shape: f32[1,128], index: 6, kind: input, shape index: {}]   ;;  %s1934_s7 = inlined_call_operand.vmem [shape: f32[1,128], index: 7, kind: input, shape index: {}]   ;;  %s1935_s8 = inlined_call_operand.<no memory space> [shape: f32[1,1], index: 8, kind: input, shape index: {}]   ;;  %s1936_s9 = inlined_call_operand.hbm [shape: f32[1,1,16], index: 9, kind: output, shape index: {}]  }
   0x1   :  { %v14_v0 = vstv %s1935_s8 }
   0x2   :  { %15 = vst [vmem:[#allocation2] sm:$0x1] %v14_v0 }
   0x3   :  { %16 = vsyncpa [#allocation4], 0 }
   0x4   :  { %17 = vsyncpa [#allocation7], 0 }
   0x5   :  { %18 = vsyncpa [#allocation10], 0 }
   0x6   :  { %19 = vsyncpa [#allocation5], 0  ;;  %s1673_s11 = smov [#allocation6]   ;;  %s1674_s13 = smov [#allocation3]  }
   0x7   :  { %s37_s12 = sshll.u32 %s1673_s11, 4  ;;  %s25_s14 = sshll.u32 %s1674_s13, 4  ;;  %s38_s12 = int_to_ptr.vmem [resolvable:$true] %s37_s12  ;;  %s1739_s14 = int_to_ptr.vmem [resolvable:$true] %s25_s14 }
   0x8   :  { %s1555_s17 = scalar_lea.hbm %s1928_s1, 512 }
   0x9   :  { %p1556_p0 = scmp.ne.s32.totalorder %s1928_s1, %s1555_s17  ;;  %p1559_p1 = scmp.lt.u32.totalorder %s1555_s17, %s1928_s1 }
   0xb   :  { %p1561_p2 = pnand %p1559_p1, %p1556_p0 }
   0xd   :  { %1564 = shalt.err (!%p1561_p2)
}
   0xe   :  { %s1565_s21 = scalar_lea.vmem %s38_s12, 512  ;;  %p1570_p4 = scmp.lt.s32.totalorder %s38_s12, %s38_s12 }
   0xf   :  { %p1566_p3 = scmp.ne.s32.totalorder %s38_s12, %s1565_s21  ;;  %p1571_p5 = scmp.lt.s32.totalorder %s1565_s21, %s1565_s21 }
  0x11   :  { %p1572_p6 = por %p1571_p5, %p1570_p4 }
  0x13   :  { %p1573_p7 = pnand %p1572_p6, %p1566_p3 }
  0x15   :  { %1576 = shalt.err (!%p1573_p7)
}
  0x16   :  { %s1675_s22 = smov 128   ;;  %s1676_s23 = smov 8  }
  0x17   :  { %43 = dma.hbm_to_vmem [thread:$0]  %s1928_s1, 512, %s38_s12, [#allocation7], %s1675_s22, %s1675_s22, %s1676_s23  }
  0x18   :  { %s1577_s28 = scalar_lea.hbm %s1927_s0, 256 }
  0x19   :  { %p1578_p8 = scmp.ne.s32.totalorder %s1927_s0, %s1577_s28  ;;  %p1581_p9 = scmp.lt.u32.totalorder %s1577_s28, %s1927_s0 }
  0x1b   :  { %p1583_p10 = pnand %p1581_p9, %p1578_p8 }
  0x1d   :  { %1586 = shalt.err (!%p1583_p10)
}
  0x1e   :  { %s1587_s13 = scalar_lea.vmem %s1739_s14, 256  ;;  %p1592_p12 = scmp.lt.s32.totalorder %s1739_s14, %s1739_s14 }
  0x1f   :  { %p1588_p11 = scmp.ne.s32.totalorder %s1739_s14, %s1587_s13  ;;  %p1593_p13 = scmp.lt.s32.totalorder %s1587_s13, %s1587_s13 }
  0x21   :  { %p1594_p0 = por %p1593_p13, %p1592_p12 }
  0x23   :  { %p1595_p1 = pnand %p1594_p0, %p1588_p11 }
  0x25   :  { %1598 = shalt.err (!%p1595_p1)
}
  0x26   :  { %31 = dma.hbm_to_vmem [thread:$0]  %s1927_s0, 256, %s1739_s14, [#allocation4], %s1675_s22, %s1675_s22, %s1676_s23  }
  0x27   :  { %s1677_s15 = smov [#allocation8]   ;;  %s1599_s19 = scalar_lea.hbm %s1930_s3, 4096 }
  0x28   :  { %s51_s16 = sshll.u32 %s1677_s15, 4  ;;  %p1600_p2 = scmp.ne.s32.totalorder %s1930_s3, %s1599_s19  ;;  %s52_s16 = int_to_ptr.vmem [resolvable:$true] %s51_s16 }
  0x29   :  { %p1603_p3 = scmp.lt.u32.totalorder %s1599_s19, %s1930_s3 }
  0x2b   :  { %p1605_p4 = pnand %p1603_p3, %p1600_p2 }
  0x2d   :  { %1608 = shalt.err (!%p1605_p4)
}
  0x2e   :  { %s1609_s25 = scalar_lea.vmem %s52_s16, 4096  ;;  %p1614_p6 = scmp.lt.s32.totalorder %s52_s16, %s52_s16 }
  0x2f   :  { %p1610_p5 = scmp.ne.s32.totalorder %s52_s16, %s1609_s25  ;;  %p1615_p7 = scmp.lt.s32.totalorder %s1609_s25, %s1609_s25 }
  0x31   :  { %p1616_p8 = por %p1615_p7, %p1614_p6 }
  0x33   :  { %p1617_p9 = pnand %p1616_p8, %p1610_p5 }
  0x35   :  { %1620 = shalt.err (!%p1617_p9)
}
  0x36   :  { %s1678_s0 = smov 1024   ;;  %s1679_s14 = smov 64  }
  0x37   :  { %57 = dma.hbm_to_vmem [thread:$0]  %s1930_s3, 4096, %s52_s16, [#allocation7], %s1678_s0, %s1678_s0, %s1679_s14  }
  0x38   :  { %s1680_s28 = smov [#allocation9]   ;;  %s1621_s11 = scalar_lea.hbm %s1932_s5, 16384 }
  0x39   :  { %s65_s29 = sshll.u32 %s1680_s28, 4  ;;  %p1622_p10 = scmp.ne.s32.totalorder %s1932_s5, %s1621_s11  ;;  %s66_s29 = int_to_ptr.vmem [resolvable:$true] %s65_s29 }
  0x3a   :  { %p1625_p11 = scmp.lt.u32.totalorder %s1621_s11, %s1932_s5 }
  0x3c   :  { %p1627_p12 = pnand %p1625_p11, %p1622_p10 }
  0x3e   :  { %1630 = shalt.err (!%p1627_p12)
}
  0x3f   :  { %s1631_s17 = scalar_lea.vmem %s66_s29, 16384  ;;  %p1636_p0 = scmp.lt.s32.totalorder %s66_s29, %s66_s29 }
  0x40   :  { %p1632_p13 = scmp.ne.s32.totalorder %s66_s29, %s1631_s17  ;;  %p1637_p1 = scmp.lt.s32.totalorder %s1631_s17, %s1631_s17 }
  0x42   :  { %p1638_p2 = por %p1637_p1, %p1636_p0 }
  0x44   :  { %p1639_p3 = pnand %p1638_p2, %p1632_p13 }
  0x46   :  { %1642 = shalt.err (!%p1639_p3)
}
  0x47   :  { %71 = dma.hbm_to_vmem [thread:$0]  %s1932_s5, 16384, %s66_s29, [#allocation10], %s1675_s22, %s1675_s22, %s1676_s23  }
  0x48   :  { %1665 = dma.done.wait [#allocation4], 256  }
  0x49   :  { %1666 = vsyncadd [#allocation4], 4294967040 }
  0x4a   :  { %1667 = dma.done.wait [#allocation7], 4608  }
  0x4b   :  { %1668 = vsyncadd [#allocation7], 4294962688 }
  0x4c   :  { %1669 = dma.done.wait [#allocation10], 16384  }
  0x4d   :  { %1670 = vsyncadd [#allocation10], 4294950912  ;;  %vm103_vm0 = vcmask 261120   ;;  %v92_v1 = vld [vmem:[#allocation6] sm:$0xff]  ;;  %v93_v2 = vld [vmem:[#allocation6 + $0x8] sm:$0xff]  ;;  %v1681_v38 = vmov 0.0  }
  0x4e   :  { %v94_v3 = vld [vmem:[#allocation6 + $0x10] sm:$0xff]  ;;  %v1366_v4 = vpack.c.bf16 %v93_v2, %v92_v1  ;;  %v95_v5 = vld [vmem:[#allocation6 + $0x18] sm:$0xff]  ;;  %v192_v8 = vld [vmem:[#allocation8 + $0x8] sm:$0xff]  ;;  %335 = vmatprep.mubr.f32.mxu1 %v1681_v38  ;;  %s1685_s8 = smov [#allocation11]  }
  0x4f   :  { %v90_v6 = vld [vmem:[#allocation3] sm:$0xff]  ;;  %v1370_v7 = vpack.c.bf16 %v95_v5, %v94_v3  ;;  %v200_v9 = vld [vmem:[#allocation8 + $0x48] sm:$0xff]  ;;  %v194_v10 = vld [vmem:[#allocation8 + $0x18] sm:$0xff]  ;;  %s1163_s20 = sshll.u32 %s1685_s8, 4  ;;  %s1164_s20 = int_to_ptr.vmem [resolvable:$true] %s1163_s20 }
  0x50   :  { %1356 = vmatprep.mubr.msk.f32.mxu0 %vm103_vm0, %v90_v6  ;;  %1367 = vmatprep.subr.bf16.mxu0 %v1366_v4  ;;  %v1374_v11 = vpack.c.bf16 %v200_v9, %v192_v8  ;;  %v202_v12 = vld [vmem:[#allocation8 + $0x58] sm:$0xff]  ;;  %v191_v15 = vld [vmem:[#allocation8] sm:$0xff]  ;;  %v193_v17 = vld [vmem:[#allocation8 + $0x10] sm:$0xff]  ;;  %s1647_s21 = scalar_lea.vmem %s1164_s20, 32  ;;  %p1648_p5 = scmp.lt.s32.totalorder %s1164_s20, %s1164_s20 }
  0x51   :  { %1369 = vmatpush3.bf16.msra.mxu0 %v1366_v4  ;;  %v1382_v13 = vpack.c.bf16 %v202_v12, %v194_v10  ;;  %v91_v14 = vld [vmem:[#allocation3 + $0x8] sm:$0xff]  ;;  %v199_v16 = vld [vmem:[#allocation8 + $0x40] sm:$0xff]  ;;  %v201_v19 = vld [vmem:[#allocation8 + $0x50] sm:$0xff] }
  0x52   :  { %1371 = vmatprep.subr.bf16.mxu0 %v1370_v7  ;;  %1375 = vmatprep.subr.bf16.mxu1 %v1374_v11  ;;  %v1376_v18 = vpack.c.bf16 %v199_v16, %v191_v15  ;;  %v1384_v20 = vpack.c.bf16 %v201_v19, %v193_v17  ;;  %v208_v21 = vld [vmem:[#allocation8 + $0x88] sm:$0xff]  ;;  %v210_v24 = vld [vmem:[#allocation8 + $0x98] sm:$0xff]  ;;  %v207_v26 = vld [vmem:[#allocation8 + $0x80] sm:$0xff] }
  0x53   :  { %v216_v22 = vld [vmem:[#allocation8 + $0xc8] sm:$0xff]  ;;  %v218_v25 = vld [vmem:[#allocation8 + $0xd8] sm:$0xff]  ;;  %v215_v28 = vld [vmem:[#allocation8 + $0xc0] sm:$0xff] }
  0x54   :  { %1377 = vmatpush1.bf16.msra.mxu1 %v1376_v18  ;;  %v1378_v23 = vpack.c.bf16 %v216_v22, %v208_v21  ;;  %v1386_v27 = vpack.c.bf16 %v218_v25, %v210_v24  ;;  %v209_v29 = vld [vmem:[#allocation8 + $0x90] sm:$0xff]  ;;  %v1380_v31 = vpack.c.bf16 %v215_v28, %v207_v26  ;;  %v196_v33 = vld [vmem:[#allocation8 + $0x28] sm:$0xff]  ;;  %v198_v35 = vld [vmem:[#allocation8 + $0x38] sm:$0xff] }
  0x55   :  { %1373 = vmatpush3.bf16.msra.mxu0 %v1370_v7  ;;  %v217_v30 = vld [vmem:[#allocation8 + $0xd0] sm:$0xff]  ;;  %v204_v34 = vld [vmem:[#allocation8 + $0x68] sm:$0xff]  ;;  %v206_v37 = vld [vmem:[#allocation8 + $0x78] sm:$0xff] }
  0x56   :  { %1383 = vmatprep.subr.bf16.mxu0 %v1382_v13  ;;  %1379 = vmatprep.subr.bf16.mxu1 %v1378_v23  ;;  %v1388_v32 = vpack.c.bf16 %v217_v30, %v209_v29  ;;  %v1390_v36 = vpack.c.bf16 %v204_v34, %v196_v33  ;;  %v1398_v39 = vpack.c.bf16 %v206_v37, %v198_v35  ;;  %v1174_v40 = vld [vmem:[%s1929_s2] ss:$0 sm:$0xff]  ;;  %v195_v42 = vld [vmem:[#allocation8 + $0x20] sm:$0xff]  ;;  %v197_v45 = vld [vmem:[#allocation8 + $0x30] sm:$0xff] }
  0x57   :  { %v203_v44 = vld [vmem:[#allocation8 + $0x60] sm:$0xff]  ;;  %v205_v46 = vld [vmem:[#allocation8 + $0x70] sm:$0xff]  ;;  %v212_v49 = vld [vmem:[#allocation8 + $0xa8] sm:$0xff] }
  0x58   :  { %1357 = vmatmul.mubr.msk.f32.vlgmr.msra.gmra.mrb[0].mxu0 %vm103_vm0, %v91_v14  ;;  %1381 = vmatpush1.bf16.msra.mxu1 %v1380_v31  ;;  %v220_v50 = vld [vmem:[#allocation8 + $0xe8] sm:$0xff]  ;;  %v214_v51 = vld [vmem:[#allocation8 + $0xb8] sm:$0xff]  ;;  %v1392_v54 = vpack.c.bf16 %v203_v44, %v195_v42  ;;  %v1400_v55 = vpack.c.bf16 %v205_v46, %v197_v45  ;;  %v211_v56 = vld [vmem:[#allocation8 + $0xa0] sm:$0xff] }
  0x59   :  { %1385 = vmatpush1.bf16.msra.mxu0 %v1384_v20  ;;  %412 = vmatprep.mubr.f32.mxu0 %v1681_v38  ;;  %v222_v52 = vld [vmem:[#allocation8 + $0xf8] sm:$0xff]  ;;  %v219_v57 = vld [vmem:[#allocation8 + $0xe0] sm:$0xff]  ;;  %v213_v58 = vld [vmem:[#allocation8 + $0xb0] sm:$0xff]  ;;  %v1394_v62 = vpack.c.bf16 %v220_v50, %v212_v49 }
  0x5a   :  { %1387 = vmatprep.subr.bf16.mxu0 %v1386_v27  ;;  %1391 = vmatprep.subr.bf16.mxu1 %v1390_v36  ;;  %v221_v59 = vld [vmem:[#allocation8 + $0xf0] sm:$0xff]  ;;  %v1402_v63 = vpack.c.bf16 %v222_v52, %v214_v51  ;;  %v643_v0 = vld [vmem:[#allocation9 + $0x80] sm:$0xff]  ;;  %v644_v1 = vld [vmem:[#allocation9 + $0x88] sm:$0xff]  ;;  %v1396_v4 = vpack.c.bf16 %v219_v57, %v211_v56 }
  0x5b   :  { %v675_v2 = vld [vmem:[#allocation9 + $0x180] sm:$0xff]  ;;  %v676_v3 = vld [vmem:[#allocation9 + $0x188] sm:$0xff]  ;;  %v1404_v5 = vpack.c.bf16 %v221_v59, %v213_v58  ;;  %v1406_v9 = vpack.c.bf16 %v644_v1, %v643_v0  ;;  %v645_v13 = vld [vmem:[#allocation9 + $0x90] sm:$0xff] }
  0x5c   :  { %v627_v6 = vld [vmem:[#allocation9] sm:$0xff]  ;;  %v628_v7 = vld [vmem:[#allocation9 + $0x8] sm:$0xff]  ;;  %v1438_v10 = vpack.c.bf16 %v676_v3, %v675_v2  ;;  %v646_v14 = vld [vmem:[#allocation9 + $0x98] sm:$0xff] }
  0x5d   :  { %1389 = vmatpush1.bf16.msra.mxu0 %v1388_v32  ;;  %v659_v11 = vld [vmem:[#allocation9 + $0x100] sm:$0xff]  ;;  %v660_v12 = vld [vmem:[#allocation9 + $0x108] sm:$0xff]  ;;  %v677_v15 = vld [vmem:[#allocation9 + $0x190] sm:$0xff]  ;;  %v1408_v17 = vpack.c.bf16 %v628_v7, %v627_v6  ;;  %v1410_v21 = vpack.c.bf16 %v646_v14, %v645_v13 }
  0x5e   :  { %1399 = vmatprep.subr.bf16.mxu0 %v1398_v39  ;;  %v678_v16 = vld [vmem:[#allocation9 + $0x198] sm:$0xff]  ;;  %v1440_v18 = vpack.c.bf16 %v660_v12, %v659_v11  ;;  %v629_v19 = vld [vmem:[#allocation9 + $0x10] sm:$0xff]  ;;  %v647_v25 = vld [vmem:[#allocation9 + $0xa0] sm:$0xff] }
  0x5f   :  { %v630_v20 = vld [vmem:[#allocation9 + $0x18] sm:$0xff]  ;;  %v1442_v22 = vpack.c.bf16 %v678_v16, %v677_v15  ;;  %v661_v23 = vld [vmem:[#allocation9 + $0x110] sm:$0xff]  ;;  %v648_v26 = vld [vmem:[#allocation9 + $0xa8] sm:$0xff] }
  0x60   :  { %v662_v24 = vld [vmem:[#allocation9 + $0x118] sm:$0xff]  ;;  %v679_v27 = vld [vmem:[#allocation9 + $0x1a0] sm:$0xff]  ;;  %v680_v28 = vld [vmem:[#allocation9 + $0x1a8] sm:$0xff]  ;;  %v1412_v29 = vpack.c.bf16 %v630_v20, %v629_v19  ;;  %v1414_v33 = vpack.c.bf16 %v648_v26, %v647_v25 }
  0x61   :  { %v1444_v30 = vpack.c.bf16 %v662_v24, %v661_v23  ;;  %v631_v31 = vld [vmem:[#allocation9 + $0x20] sm:$0xff]  ;;  %v632_v32 = vld [vmem:[#allocation9 + $0x28] sm:$0xff]  ;;  %v1446_v34 = vpack.c.bf16 %v680_v28, %v679_v27  ;;  %v649_v37 = vld [vmem:[#allocation9 + $0xb0] sm:$0xff] }
  0x62   :  { %v663_v35 = vld [vmem:[#allocation9 + $0x120] sm:$0xff]  ;;  %v664_v36 = vld [vmem:[#allocation9 + $0x128] sm:$0xff]  ;;  %v650_v39 = vld [vmem:[#allocation9 + $0xb8] sm:$0xff]  ;;  %v1416_v42 = vpack.c.bf16 %v632_v32, %v631_v31 }
  0x63   :  { %v633_v44 = vld [vmem:[#allocation9 + $0x30] sm:$0xff]  ;;  %v634_v45 = vld [vmem:[#allocation9 + $0x38] sm:$0xff]  ;;  %v1418_v46 = vpack.c.bf16 %v650_v39, %v649_v37  ;;  %v651_v50 = vld [vmem:[#allocation9 + $0xc0] sm:$0xff] }
  0x64   :  { %v666_v49 = vld [vmem:[#allocation9 + $0x138] sm:$0xff]  ;;  %v652_v51 = vld [vmem:[#allocation9 + $0xc8] sm:$0xff]  ;;  %v683_v52 = vld [vmem:[#allocation9 + $0x1c0] sm:$0xff] }
  0x65   :  { %v635_v56 = vld [vmem:[#allocation9 + $0x40] sm:$0xff]  ;;  %v636_v57 = vld [vmem:[#allocation9 + $0x48] sm:$0xff]  ;;  %v1422_v58 = vpack.c.bf16 %v652_v51, %v651_v50  ;;  %v685_v0 = vld [vmem:[#allocation9 + $0x1d0] sm:$0xff] }
  0x66   :  { %v686_v1 = vld [vmem:[#allocation9 + $0x1d8] sm:$0xff]  ;;  %v1424_v2 = vpack.c.bf16 %v636_v57, %v635_v56  ;;  %v656_v11 = vld [vmem:[#allocation9 + $0xe8] sm:$0xff]  ;;  %v687_v12 = vld [vmem:[#allocation9 + $0x1e0] sm:$0xff] }
  0x67   :  { %v1458_v7 = vpack.c.bf16 %v686_v1, %v685_v0  ;;  %v688_v13 = vld [vmem:[#allocation9 + $0x1e8] sm:$0xff]  ;;  %v671_v20 = vld [vmem:[#allocation9 + $0x160] sm:$0xff]  ;;  %v657_v24 = vld [vmem:[#allocation9 + $0xf0] sm:$0xff] }
  0x68   :  { %v640_v19 = vld [vmem:[#allocation9 + $0x68] sm:$0xff]  ;;  %v658_v25 = vld [vmem:[#allocation9 + $0xf8] sm:$0xff]  ;;  %v689_v26 = vld [vmem:[#allocation9 + $0x1f0] sm:$0xff] }
  0x69   :  { %v1434_v27 = vpack.c.bf16 %v658_v25, %v657_v24  ;;  %v690_v28 = vld [vmem:[#allocation9 + $0x1f8] sm:$0xff]  ;;  %v708_v37 = vld [vmem:[#allocation9 + $0x288] sm:$0xff]  ;;  %v739_v39 = vld [vmem:[#allocation9 + $0x380] sm:$0xff] }
  0x6a   :  { %v1466_v31 = vpack.c.bf16 %v690_v28, %v689_v26  ;;  %v1862_v24 = vld [vmem:[#allocation9 + $0x210] sm:$0xff]  ;;  %v1864_v25 = vld [vmem:[#allocation9 + $0x218] sm:$0xff] }
  0x6b   :  { %v725_v26 = vld [vmem:[#allocation9 + $0x310] sm:$0xff] }
 0x12b   :  { %v1358_v41 = vpop.f32.mrb[0].mxu0 }
 0x12c   :  { %v176_v43 = vpop.f32.mrb[1].mxu0  ;;  %v182_v47 = vadd.f32 %v1358_v41, %v1174_v40  ;;  %v682_v41 = vld [vmem:[#allocation9 + $0x1b8] sm:$0xff] }
 0x12d   :  { %v177_v48 = vadd.f32 %v1174_v40, %v176_v43  ;;  %v681_v40 = vld [vmem:[#allocation9 + $0x1b0] sm:$0xff]  ;;  %v1448_v43 = vpack.c.bf16 %v664_v36, %v663_v35  ;;  %v707_v36 = vld [vmem:[#allocation9 + $0x280] sm:$0xff] }
 0x12e   :  { %v188_v60 = vmul.f32 0.2, %v182_v47  ;;  %vm186_vm2 = vcmp.gt.f32.partialorder %v182_v47, 0.0 }
 0x12f   :  { %vm185_vm1 = vcmp.gt.f32.partialorder %v177_v48, 0.0  ;;  %v187_v53 = vmul.f32 0.2, %v177_v48 }
 0x130   :  { %v190_v8 = vsel %vm186_vm2, %v182_v47, %v188_v60  ;;  %v1450_v47 = vpack.c.bf16 %v682_v41, %v681_v40  ;;  %v667_v60 = vld [vmem:[#allocation9 + $0x140] sm:$0xff]  ;;  %v1470_v40 = vpack.c.bf16 %v708_v37, %v707_v36  ;;  %v740_v41 = vld [vmem:[#allocation9 + $0x388] sm:$0xff] }
 0x131   :  { %v189_v61 = vsel %vm185_vm1, %v177_v48, %v187_v53  ;;  %v665_v48 = vld [vmem:[#allocation9 + $0x130] sm:$0xff]  ;;  %v684_v53 = vld [vmem:[#allocation9 + $0x1c8] sm:$0xff] }
 0x132   :  { %1177 = vmatmul.mubr.msk.f32.vlgmr.msra.gmra.mrb[0].mxu1 %vm103_vm0, %v189_v61  ;;  %1179 = vmatmul.mubr.msk.f32.vlgmr.msra.gmra.mrb[2].mxu0 %vm103_vm0, %v189_v61  ;;  %v1454_v59 = vpack.c.bf16 %v684_v53, %v683_v52 }
 0x133   :  { %1393 = vmatpush1.bf16.msra.mxu1 %v1392_v54  ;;  %1401 = vmatpush1.bf16.msra.mxu0 %v1400_v55  ;;  %v1420_v54 = vpack.c.bf16 %v634_v45, %v633_v44  ;;  %v1452_v55 = vpack.c.bf16 %v666_v49, %v665_v48 }
 0x134   :  { %341 = vmatprep.mubr.f32.mxu1 %v1681_v38  ;;  %418 = vmatprep.mubr.f32.mxu0 %v1681_v38 }
 0x135   :  { %1395 = vmatprep.subr.bf16.mxu1 %v1394_v62  ;;  %1403 = vmatprep.subr.bf16.mxu0 %v1402_v63  ;;  %v653_v62 = vld [vmem:[#allocation9 + $0xd0] sm:$0xff]  ;;  %v654_v63 = vld [vmem:[#allocation9 + $0xd8] sm:$0xff] }
 0x136   :  { %1178 = vmatmul.mubr.msk.f32.gmra.mrb[2].mxu1 %vm103_vm0, %v190_v8  ;;  %1180 = vmatmul.mubr.msk.f32.gmra.mrb[4].mxu0 %vm103_vm0, %v190_v8  ;;  %v1426_v6 = vpack.c.bf16 %v654_v63, %v653_v62 }
 0x137   :  { %1397 = vmatpush1.bf16.msra.mxu1 %v1396_v4  ;;  %1405 = vmatpush1.bf16.msra.mxu0 %v1404_v5  ;;  %v637_v4 = vld [vmem:[#allocation9 + $0x50] sm:$0xff]  ;;  %v638_v5 = vld [vmem:[#allocation9 + $0x58] sm:$0xff] }
 0x138   :  { %489 = vmatprep.mubr.f32.mxu1 %v1681_v38  ;;  %566 = vmatprep.mubr.f32.mxu0 %v1681_v38  ;;  %v1428_v14 = vpack.c.bf16 %v638_v5, %v637_v4  ;;  %v709_v4 = vld [vmem:[#allocation9 + $0x290] sm:$0xff]  ;;  %v710_v5 = vld [vmem:[#allocation9 + $0x298] sm:$0xff] }
 0x139   :  { %1407 = vmatprep.subr.bf16.mxu1 %v1406_v9  ;;  %1439 = vmatprep.subr.bf16.mxu0 %v1438_v10  ;;  %v670_v9 = vld [vmem:[#allocation9 + $0x158] sm:$0xff]  ;;  %v655_v10 = vld [vmem:[#allocation9 + $0xe0] sm:$0xff] }
 0x13a   :  { %1181 = vmatmul.mubr.msk.f32.vlgmr.msra.gmra.mrb[4].mxu1 %vm103_vm0, %v189_v61  ;;  %1183 = vmatmul.mubr.msk.f32.vlgmr.msra.gmra.mrb[6].mxu0 %vm103_vm0, %v189_v61  ;;  %v668_v61 = vld [vmem:[#allocation9 + $0x148] sm:$0xff]  ;;  %v1430_v16 = vpack.c.bf16 %v656_v11, %v655_v10  ;;  %v1852_v10 = vld [vmem:[#allocation9 + $0x390] sm:$0xff]  ;;  %v1854_v11 = vld [vmem:[#allocation9 + $0x398] sm:$0xff] }
 0x13b   :  { %495 = vmatprep.mubr.f32.mxu1 %v1681_v38  ;;  %572 = vmatprep.mubr.f32.mxu0 %v1681_v38  ;;  %v1456_v3 = vpack.c.bf16 %v668_v61, %v667_v60 }
 0x13c   :  { %1409 = vmatpush3.bf16.msra.mxu1 %v1408_v17  ;;  %1441 = vmatpush3.bf16.msra.mxu0 %v1440_v18  ;;  %v1462_v17 = vpack.c.bf16 %v688_v13, %v687_v12  ;;  %v639_v18 = vld [vmem:[#allocation9 + $0x60] sm:$0xff] }
 0x13d   :  { %1411 = vmatprep.subr.bf16.mxu1 %v1410_v21  ;;  %1443 = vmatprep.subr.bf16.mxu0 %v1442_v22  ;;  %v1432_v21 = vpack.c.bf16 %v640_v19, %v639_v18  ;;  %v672_v22 = vld [vmem:[#allocation9 + $0x168] sm:$0xff] }
 0x13e   :  { %1182 = vmatmul.mubr.msk.f32.gmra.mrb[6].mxu1 %vm103_vm0, %v190_v8  ;;  %1184 = vmatmul.mubr.msk.f32.gmra.mrb[8].mxu0 %vm103_vm0, %v190_v8  ;;  %v669_v8 = vld [vmem:[#allocation9 + $0x150] sm:$0xff]  ;;  %v1464_v23 = vpack.c.bf16 %v672_v22, %v671_v20 }
 0x13f   :  { %v1460_v15 = vpack.c.bf16 %v670_v9, %v669_v8 }
 0x140   :  { %1413 = vmatpush3.bf16.msra.mxu1 %v1412_v29  ;;  %1445 = vmatpush3.bf16.msra.mxu0 %v1444_v30  ;;  %v641_v29 = vld [vmem:[#allocation9 + $0x70] sm:$0xff]  ;;  %v642_v30 = vld [vmem:[#allocation9 + $0x78] sm:$0xff] }
 0x141   :  { %1415 = vmatprep.subr.bf16.mxu1 %v1414_v33  ;;  %1447 = vmatprep.subr.bf16.mxu0 %v1446_v34  ;;  %v1436_v32 = vpack.c.bf16 %v642_v30, %v641_v29  ;;  %v673_v33 = vld [vmem:[#allocation9 + $0x170] sm:$0xff]  ;;  %v674_v34 = vld [vmem:[#allocation9 + $0x178] sm:$0xff] }
 0x142   :  { %v1468_v35 = vpack.c.bf16 %v674_v34, %v673_v33  ;;  %v1870_v33 = vld [vmem:[#allocation9 + $0x2a8] sm:$0xff]  ;;  %v743_v34 = vld [vmem:[#allocation9 + $0x3a0] sm:$0xff] }
 0x144   :  { %1417 = vmatpush3.bf16.msra.mxu1 %v1416_v42  ;;  %1449 = vmatpush3.bf16.msra.mxu0 %v1448_v43  ;;  %v1502_v42 = vpack.c.bf16 %v740_v41, %v739_v39  ;;  %v225_v43 = vlaneseq }
 0x145   :  { %1419 = vmatprep.subr.bf16.mxu1 %v1418_v46  ;;  %1451 = vmatprep.subr.bf16.mxu0 %v1450_v47  ;;  %v1831_v47 = vld [vmem:[%s1931_s4] sm:$0xff] }
 0x146   :  { %v1824_v44 = vshrl.u32 %v225_v43, 7 }
 0x148   :  { %1421 = vmatpush3.bf16.msra.mxu1 %v1420_v54  ;;  %1453 = vmatpush3.bf16.msra.mxu0 %v1452_v55  ;;  %v227_v45 = vsub.s32 0, %v1824_v44  ;;  %v235_v46 = vsub.s32 2, %v1824_v44  ;;  %v231_v48 = vsub.s32 1, %v1824_v44  ;;  %v239_v49 = vsub.s32 3, %v1824_v44  ;;  %v1841_v54 = vld [vmem:[#allocation9 + $0x200] sm:$0xff]  ;;  %v1843_v55 = vld [vmem:[#allocation9 + $0x208] sm:$0xff] }
 0x149   :  { %1423 = vmatprep.subr.bf16.mxu1 %v1422_v58  ;;  %1455 = vmatprep.subr.bf16.mxu0 %v1454_v59  ;;  %v1845_v58 = vld [vmem:[#allocation9 + $0x300] sm:$0xff]  ;;  %v724_v59 = vld [vmem:[#allocation9 + $0x308] sm:$0xff]  ;;  %v247_v60 = vsub.s32 5, %v1824_v44  ;;  %v255_v61 = vsub.s32 7, %v1824_v44  ;;  %v1472_v8 = vpack.c.bf16 %v1843_v55, %v1841_v54  ;;  %v1476_v55 = vpack.c.bf16 %v1864_v25, %v1862_v24 }
 0x14a   :  { %v228_v50 = vrot.slane %v1831_v47, %v227_v45  ;;  %v236_v51 = vrot.slane %v1831_v47, %v235_v46  ;;  %v232_v52 = vrot.slane %v1831_v47, %v231_v48  ;;  %v240_v53 = vrot.slane %v1831_v47, %v239_v49  ;;  %v715_v24 = vld [vmem:[#allocation9 + $0x2c0] sm:$0xff]  ;;  %v716_v25 = vld [vmem:[#allocation9 + $0x2c8] sm:$0xff] }
 0x14b   :  { %v1504_v9 = vpack.c.bf16 %v724_v59, %v1845_v58  ;;  %v727_v58 = vld [vmem:[#allocation9 + $0x320] sm:$0xff]  ;;  %v728_v59 = vld [vmem:[#allocation9 + $0x328] sm:$0xff] }
 0x14c   :  { %1425 = vmatpush3.bf16.msra.mxu1 %v1424_v2  ;;  %1457 = vmatpush3.bf16.msra.mxu0 %v1456_v3 }
 0x14d   :  { %1427 = vmatprep.subr.bf16.mxu1 %v1426_v6  ;;  %1459 = vmatprep.subr.bf16.mxu0 %v1458_v7 }
 0x150   :  { %1429 = vmatpush3.bf16.msra.mxu1 %v1428_v14  ;;  %1461 = vmatpush3.bf16.msra.mxu0 %v1460_v15 }
 0x151   :  { %1431 = vmatprep.subr.bf16.mxu1 %v1430_v16  ;;  %1463 = vmatprep.subr.bf16.mxu0 %v1462_v17  ;;  %v1857_v16 = vrot.slane %v1831_v47, %v247_v60  ;;  %v1860_v17 = vrot.slane %v1831_v47, %v255_v61 }
 0x154   :  { %1433 = vmatpush3.bf16.msra.mxu1 %v1432_v21  ;;  %1465 = vmatpush3.bf16.msra.mxu0 %v1464_v23  ;;  %v1474_v21 = vpack.c.bf16 %v710_v5, %v709_v4 }
 0x155   :  { %1435 = vmatprep.subr.bf16.mxu1 %v1434_v27  ;;  %1467 = vmatprep.subr.bf16.mxu0 %v1466_v31  ;;  %v726_v27 = vld [vmem:[#allocation9 + $0x318] sm:$0xff]  ;;  %v1506_v31 = vpack.c.bf16 %v1854_v11, %v1852_v10  ;;  %v1512_v10 = vpack.c.bf16 %v728_v59, %v727_v58 }
 0x156   :  { %v1508_v49 = vpack.c.bf16 %v726_v27, %v725_v26 }
 0x158   :  { %1437 = vmatpush3.bf16.msra.mxu1 %v1436_v32  ;;  %1469 = vmatpush3.bf16.msra.mxu0 %v1468_v35  ;;  %v1868_v32 = vld [vmem:[#allocation9 + $0x2a0] sm:$0xff]  ;;  %v744_v35 = vld [vmem:[#allocation9 + $0x3a8] sm:$0xff] }
 0x159   :  { %1471 = vmatprep.subr.bf16.mxu1 %v1470_v40  ;;  %1503 = vmatprep.subr.bf16.mxu0 %v1502_v42 }
 0x205   :  { %v337_v56 = vpop.f32.mrb[0].mxu1  ;;  %v414_v57 = vpop.f32.mrb[2].mxu0 }
 0x206   :  { %v338_v62 = vadd.f32 %v337_v56, %v228_v50  ;;  %v415_v63 = vadd.f32 %v414_v57, %v236_v51  ;;  %v339_v0 = vpop.f32.mrb[1].mxu1  ;;  %v416_v1 = vpop.f32.mrb[3].mxu0  ;;  %v1510_v56 = vpack.c.bf16 %v744_v35, %v743_v34  ;;  %v696_v57 = vld [vmem:[#allocation9 + $0x228] sm:$0xff]  ;;  %v749_v34 = vld [vmem:[#allocation9 + $0x3d0] sm:$0xff]  ;;  %v750_v35 = vld [vmem:[#allocation9 + $0x3d8] sm:$0xff] }
 0x207   :  { %v340_v2 = vadd.f32 %v339_v0, %v232_v52  ;;  %v417_v3 = vadd.f32 %v416_v1, %v240_v53  ;;  %v1478_v0 = vpack.c.bf16 %v1870_v33, %v1868_v32  ;;  %v745_v1 = vld [vmem:[#allocation9 + $0x3b0] sm:$0xff]  ;;  %v1486_v32 = vpack.c.bf16 %v716_v25, %v715_v24  ;;  %v700_v33 = vld [vmem:[#allocation9 + $0x248] sm:$0xff] }
 0x208   :  { %v595_v6 = vmul.f32 0.2, %v338_v62  ;;  %v597_v7 = vmul.f32 0.2, %v415_v63  ;;  %vm579_vm3 = vcmp.gt.f32.partialorder %v338_v62, 0.0  ;;  %vm581_vm4 = vcmp.gt.f32.partialorder %v415_v63, 0.0 }
 0x209   :  { %v596_v12 = vmul.f32 0.2, %v340_v2  ;;  %v598_v13 = vmul.f32 0.2, %v417_v3  ;;  %v343_v14 = vpop.f32.mrb[2].mxu1  ;;  %v420_v15 = vpop.f32.mrb[4].mxu0 }
 0x20a   :  { %v344_v18 = vadd.f32 %v343_v14, %v228_v50  ;;  %v345_v19 = vpop.f32.mrb[3].mxu1  ;;  %v422_v20 = vpop.f32.mrb[5].mxu0  ;;  %vm580_vm5 = vcmp.gt.f32.partialorder %v340_v2, 0.0  ;;  %vm582_vm6 = vcmp.gt.f32.partialorder %v417_v3, 0.0  ;;  %v421_v28 = vadd.f32 %v420_v15, %v236_v51  ;;  %v697_v14 = vld [vmem:[#allocation9 + $0x230] sm:$0xff] }
 0x20b   :  { %v346_v22 = vadd.f32 %v345_v19, %v232_v52  ;;  %v423_v23 = vadd.f32 %v422_v20, %v240_v53  ;;  %v612_v29 = vsel %vm580_vm5, %v340_v2, %v596_v12  ;;  %v614_v30 = vsel %vm582_vm6, %v417_v3, %v598_v13  ;;  %v695_v53 = vld [vmem:[#allocation9 + $0x220] sm:$0xff]  ;;  %v746_v2 = vld [vmem:[#allocation9 + $0x3b8] sm:$0xff]  ;;  %v729_v15 = vld [vmem:[#allocation9 + $0x330] sm:$0xff] }
 0x20c   :  { %v611_v36 = vsel %vm579_vm3, %v338_v62, %v595_v6  ;;  %v613_v37 = vsel %vm581_vm4, %v415_v63, %v597_v7  ;;  %826 = vmatprep.mubr.f32.mxu1 %v612_v29  ;;  %901 = vmatprep.mubr.f32.mxu0 %v614_v30  ;;  %v603_v43 = vmul.f32 0.2, %v344_v18  ;;  %vm587_vm9 = vcmp.gt.f32.partialorder %v344_v18, 0.0  ;;  %v713_v7 = vld [vmem:[#allocation9 + $0x2b0] sm:$0xff]  ;;  %v698_v20 = vld [vmem:[#allocation9 + $0x238] sm:$0xff]  ;;  %v699_v29 = vld [vmem:[#allocation9 + $0x240] sm:$0xff] }
 0x20d   :  { %v604_v39 = vmul.f32 0.2, %v346_v22  ;;  %v606_v40 = vmul.f32 0.2, %v423_v23  ;;  %v1874_v41 = vpop.f32.mrb[4].mxu1  ;;  %v1876_v42 = vpop.f32.mrb[6].mxu0  ;;  %827 = vmatmul.mubr.f32.vlgmr.msra.gmra.mrb[8].mxu1 %v611_v36  ;;  %902 = vmatmul.mubr.f32.vlgmr.msra.gmra.mrb[10].mxu0 %v613_v37  ;;  %v1514_v13 = vpack.c.bf16 %v746_v2, %v745_v1  ;;  %v1484_v27 = vpack.c.bf16 %v698_v20, %v697_v14 }
 0x20e   :  { %v493_v46 = vpop.f32.mrb[5].mxu1  ;;  %v570_v48 = vpop.f32.mrb[7].mxu0  ;;  %vm588_vm7 = vcmp.gt.f32.partialorder %v346_v22, 0.0  ;;  %vm590_vm8 = vcmp.gt.f32.partialorder %v423_v23, 0.0  ;;  %1473 = vmatpush3.bf16.msra.mxu1 %v1472_v8  ;;  %1505 = vmatpush3.bf16.msra.mxu0 %v1504_v9  ;;  %v605_v54 = vmul.f32 0.2, %v421_v28  ;;  %v619_v4 = vsel %vm587_vm9, %v344_v18, %v603_v43 }
 0x20f   :  { %v494_v50 = vadd.f32 %v493_v46, %v1857_v16  ;;  %v571_v51 = vadd.f32 %v570_v48, %v1860_v17  ;;  %v620_v52 = vsel %vm588_vm7, %v346_v22, %v604_v39  ;;  %1475 = vmatprep.subr.bf16.mxu1 %v1474_v21  ;;  %v622_v61 = vsel %vm590_vm8, %v423_v23, %v606_v40  ;;  %v714_v8 = vld [vmem:[#allocation9 + $0x2b8] sm:$0xff]  ;;  %v747_v21 = vld [vmem:[#allocation9 + $0x3c0] sm:$0xff]  ;;  %v748_v22 = vld [vmem:[#allocation9 + $0x3c8] sm:$0xff] }
 0x210   :  { %831 = vmatprep.mubr.f32.mxu1 %v620_v52  ;;  %1507 = vmatprep.subr.bf16.mxu0 %v1506_v31  ;;  %vm589_vm10 = vcmp.gt.f32.partialorder %v421_v28, 0.0  ;;  %v1480_v9 = vpack.c.bf16 %v696_v57, %v695_v53  ;;  %v730_v18 = vld [vmem:[#allocation9 + $0x338] sm:$0xff]  ;;  %v1482_v19 = vpack.c.bf16 %v714_v8, %v713_v7  ;;  %v731_v30 = vld [vmem:[#allocation9 + $0x340] sm:$0xff]  ;;  %v732_v31 = vld [vmem:[#allocation9 + $0x348] sm:$0xff]  ;;  %v1488_v40 = vpack.c.bf16 %v700_v33, %v699_v29 }
 0x211   :  { %v600_v60 = vmul.f32 0.2, %v494_v50  ;;  %v1883_v62 = vpop.f32.mrb[6].mxu1  ;;  %v1885_v63 = vpop.f32.mrb[8].mxu0  ;;  %v602_v3 = vmul.f32 0.2, %v571_v51  ;;  %906 = vmatprep.mubr.f32.mxu0 %v622_v61  ;;  %832 = vmatmul.mubr.f32.gmra.mrb[10].mxu1 %v619_v4  ;;  %v621_v11 = vsel %vm589_vm10, %v421_v28, %v605_v54  ;;  %v1516_v26 = vpack.c.bf16 %v730_v18, %v729_v15 }
 0x212   :  { %v1890_v5 = vpop.f32.mrb[7].mxu1  ;;  %v1892_v6 = vpop.f32.mrb[9].mxu0  ;;  %1509 = vmatpush3.bf16.msra.mxu0 %v1508_v49  ;;  %vm584_vm11 = vcmp.gt.f32.partialorder %v494_v50, 0.0  ;;  %1477 = vmatpush3.bf16.msra.mxu1 %v1476_v55  ;;  %vm586_vm12 = vcmp.gt.f32.partialorder %v571_v51, 0.0  ;;  %v1518_v28 = vpack.c.bf16 %v748_v22, %v747_v21  ;;  %v717_v36 = vld [vmem:[#allocation9 + $0x2d0] sm:$0xff]  ;;  %v718_v37 = vld [vmem:[#allocation9 + $0x2d8] sm:$0xff]  ;;  %v1520_v39 = vpack.c.bf16 %v732_v31, %v731_v30 }
 0x213   :  { %v616_v12 = vsel %vm584_vm11, %v494_v50, %v600_v60  ;;  %1511 = vmatprep.subr.bf16.mxu0 %v1510_v56  ;;  %907 = vmatmul.mubr.f32.gmra.mrb[12].mxu0 %v621_v11  ;;  %v618_v23 = vsel %vm586_vm12, %v571_v51, %v602_v3  ;;  %v1522_v43 = vpack.c.bf16 %v750_v35, %v749_v34  ;;  %v701_v46 = vld [vmem:[#allocation9 + $0x250] sm:$0xff]  ;;  %v734_v49 = vld [vmem:[#allocation9 + $0x358] sm:$0xff]  ;;  %v251_v50 = vsub.s32 6, %v1824_v44  ;;  %v751_v53 = vld [vmem:[#allocation9 + $0x3e0] sm:$0xff] }
 0x214   :  { %1479 = vmatprep.subr.bf16.mxu1 %v1478_v0  ;;  %976 = vmatprep.mubr.f32.mxu1 %v616_v12  ;;  %v733_v48 = vld [vmem:[#allocation9 + $0x350] sm:$0xff]  ;;  %v1490_v51 = vpack.c.bf16 %v718_v37, %v717_v36  ;;  %v702_v52 = vld [vmem:[#allocation9 + $0x258] sm:$0xff]  ;;  %v752_v54 = vld [vmem:[#allocation9 + $0x3e8] sm:$0xff]  ;;  %v243_v55 = vsub.s32 4, %v1824_v44  ;;  %v500_v24 = vadd.f32 %v1890_v5, %v1857_v16  ;;  %v1682_v33 = vmov 0.0|0.0  }
 0x215   :  { %1051 = vmatprep.mubr.f32.mxu0 %v618_v23  ;;  %v719_v56 = vld [vmem:[#allocation9 + $0x2e0] sm:$0xff]  ;;  %v720_v57 = vld [vmem:[#allocation9 + $0x2e8] sm:$0xff]  ;;  %v1524_v58 = vpack.c.bf16 %v734_v49, %v733_v48  ;;  %v1492_v59 = vpack.c.bf16 %v702_v52, %v701_v46  ;;  %v1526_v60 = vpack.c.bf16 %v752_v54, %v751_v53  ;;  %v252_v2 = vrot.slane %v1831_v47, %v251_v50  ;;  %v753_v7 = vld [vmem:[#allocation9 + $0x3f0] sm:$0xff] }
 0x216   :  { %1513 = vmatpush3.bf16.msra.mxu0 %v1512_v10  ;;  %1481 = vmatpush3.bf16.msra.mxu1 %v1480_v9  ;;  %v703_v61 = vld [vmem:[#allocation9 + $0x260] sm:$0xff]  ;;  %v736_v1 = vld [vmem:[#allocation9 + $0x368] sm:$0xff]  ;;  %v1494_v3 = vpack.c.bf16 %v720_v57, %v719_v56  ;;  %v754_v8 = vld [vmem:[#allocation9 + $0x3f8] sm:$0xff]  ;;  %v244_v9 = vrot.slane %v1831_v47, %v243_v55  ;;  %v577_v47 = vadd.f32 %v1892_v6, %v1860_v17  ;;  %v608_v30 = vmul.f32 0.2, %v500_v24 }
 0x217   :  { %1515 = vmatprep.subr.bf16.mxu0 %v1514_v13  ;;  %1483 = vmatprep.subr.bf16.mxu1 %v1482_v19  ;;  %v735_v0 = vld [vmem:[#allocation9 + $0x360] sm:$0xff]  ;;  %v704_v4 = vld [vmem:[#allocation9 + $0x268] sm:$0xff]  ;;  %v721_v10 = vld [vmem:[#allocation9 + $0x2f0] sm:$0xff]  ;;  %v1530_v14 = vpack.c.bf16 %v754_v8, %v753_v7  ;;  %v569_v19 = vadd.f32 %v1876_v42, %v252_v2  ;;  %v575_v42 = vadd.f32 %v1885_v63, %v252_v2  ;;  %vm592_vm0 = vcmp.gt.f32.partialorder %v500_v24, 0.0 }
 0x218   :  { %v722_v11 = vld [vmem:[#allocation9 + $0x2f8] sm:$0xff]  ;;  %v1528_v12 = vpack.c.bf16 %v736_v1, %v735_v0  ;;  %v1496_v13 = vpack.c.bf16 %v704_v4, %v703_v61  ;;  %v737_v15 = vld [vmem:[#allocation9 + $0x370] sm:$0xff]  ;;  %v492_v23 = vadd.f32 %v1874_v41, %v244_v9  ;;  %v498_v29 = vadd.f32 %v1883_v62, %v244_v9  ;;  %v1069_v34 = vld [vmem:[#allocation2] sm:$0x1] }
 0x219   :  { %v738_v18 = vld [vmem:[#allocation9 + $0x378] sm:$0xff]  ;;  %v1498_v20 = vpack.c.bf16 %v722_v11, %v721_v10  ;;  %v705_v21 = vld [vmem:[#allocation9 + $0x270] sm:$0xff]  ;;  %vm585_vm13 = vcmp.gt.f32.partialorder %v569_v19, 0.0  ;;  %v610_v41 = vmul.f32 0.2, %v577_v47  ;;  %vm594_vm15 = vcmp.gt.f32.partialorder %v577_v47, 0.0 }
 0x21a   :  { %1517 = vmatpush3.bf16.msra.mxu0 %v1516_v26  ;;  %1485 = vmatpush3.bf16.msra.mxu1 %v1484_v27  ;;  %v706_v22 = vld [vmem:[#allocation9 + $0x278] sm:$0xff]  ;;  %v1532_v25 = vpack.c.bf16 %v738_v18, %v737_v15  ;;  %v601_v27 = vmul.f32 0.2, %v569_v19  ;;  %vm583_vm14 = vcmp.gt.f32.partialorder %v492_v23, 0.0  ;;  %v609_v17 = vmul.f32 0.2, %v575_v42 }
 0x21b   :  { %1519 = vmatprep.subr.bf16.mxu0 %v1518_v28  ;;  %1487 = vmatprep.subr.bf16.mxu1 %v1486_v32  ;;  %v1500_v26 = vpack.c.bf16 %v706_v22, %v705_v21  ;;  %v599_v28 = vmul.f32 0.2, %v492_v23  ;;  %v607_v6 = vmul.f32 0.2, %v498_v29  ;;  %v626_v31 = vsel %vm594_vm15, %v577_v47, %v610_v41  ;;  %v1068_v21 = vld [vmem:[%s1934_s7] sm:$0x1] }
 0x21c   :  { %v617_v16 = vsel %vm585_vm13, %v569_v19, %v601_v27  ;;  %vm593_vm1 = vcmp.gt.f32.partialorder %v575_v42, 0.0  ;;  %v624_v63 = vsel %vm592_vm0, %v500_v24, %v608_v30  ;;  %vm591_vm2 = vcmp.gt.f32.partialorder %v498_v29, 0.0  ;;  %s1643_s7 = scalar_lea.vmem %s1164_s20, 16 }
 0x21d   :  { %v615_v5 = vsel %vm583_vm14, %v492_v23, %v599_v28  ;;  %v625_v62 = vsel %vm593_vm1, %v575_v42, %v609_v17  ;;  %v623_v32 = vsel %vm591_vm2, %v498_v29, %v607_v6  ;;  %vm1683_vm3 = vmmov 0   ;;  %p1644_p4 = scmp.ne.s32.totalorder %s1164_s20, %s1643_s7  ;;  %p1649_p6 = scmp.lt.s32.totalorder %s1647_s21, %s1643_s7 }
 0x21e   :  { %1521 = vmatpush3.bf16.msra.mxu0 %v1520_v39  ;;  %1489 = vmatpush3.bf16.msra.mxu1 %v1488_v40  ;;  %v1684_v35 = vmov 0   ;;  %v1185_v39 = vld [vmem:[%s1933_s6] ss:$0 sm:$0xff]  ;;  %vm1155_vm6 = vcmask 122880  }
 0x21f   :  { %1523 = vmatprep.subr.bf16.mxu0 %v1522_v43  ;;  %1491 = vmatprep.subr.bf16.mxu1 %v1490_v51  ;;  %p1650_p7 = por %p1649_p6, %p1648_p5 }
 0x220   :  { %1550 = vset.pattern.permute.xlu0 %v1684_v35 }
 0x221   :  { %1072 = vperm.xlu0 %1550, %v1069_v34   ;;  %p1651_p8 = pnand %p1650_p7, %p1644_p4 }
 0x222   :  { %1525 = vmatpush3.bf16.msra.mxu0 %v1524_v58  ;;  %1493 = vmatpush3.bf16.msra.mxu1 %v1492_v59 }
 0x223   :  { %1527 = vmatprep.subr.bf16.mxu0 %v1526_v60  ;;  %1495 = vmatprep.subr.bf16.mxu1 %v1494_v3 }
 0x226   :  { %1529 = vmatpush3.bf16.msra.mxu0 %v1528_v12  ;;  %1497 = vmatpush3.bf16.msra.mxu1 %v1496_v13 }
 0x227   :  { %1531 = vmatprep.subr.bf16.mxu0 %v1530_v14  ;;  %1499 = vmatprep.subr.bf16.mxu1 %v1498_v20 }
 0x22a   :  { %1533 = vmatpush3.bf16.msra.mxu0 %v1532_v25  ;;  %1501 = vmatpush3.bf16.msra.mxu1 %v1500_v26 }
 0x22b   :  { %1534 = vmatprep.subr.bf16.mxu1 %v1682_v33 }
 0x22d   :  { %1052 = vmatmul.mubr.f32.vlgmr.msra.gmra.mrb[14].mxu0 %v617_v16  ;;  %977 = vmatmul.mubr.f32.vlgmr.msra.gmra.mrb[12].mxu1 %v615_v5 }
 0x22e   :  { %1056 = vmatprep.mubr.f32.mxu0 %v626_v31  ;;  %981 = vmatprep.mubr.f32.mxu1 %v624_v63 }
 0x231   :  { %1057 = vmatmul.mubr.f32.gmra.mrb[16].mxu0 %v625_v62  ;;  %982 = vmatmul.mubr.f32.gmra.mrb[14].mxu1 %v623_v32 }
 0x232   :  { %1363 = vmatprep.mubr.msk.f32.mxu1 %vm1683_vm3, %v1681_v38 }
 0x2a0   :  { %v1073_v22 = vpop.permute.xlu0 %1072 }
 0x2a1   :  { %v1078_v23 = vrot.slane %v1073_v22, %v227_v45 }
 0x2e0   :  { %v1225_v36 = vpop.f32.mrb[8].mxu1  ;;  %v1263_v37 = vpop.f32.mrb[10].mxu0 }
 0x2e1   :  { %v1226_v40 = vpop.f32.mrb[9].mxu1  ;;  %v1264_v43 = vpop.f32.mrb[11].mxu0 }
 0x2e2   :  { %v1227_v46 = vadd.f32 %v1226_v40, %v1225_v36  ;;  %v1265_v48 = vadd.f32 %v1264_v43, %v1263_v37 }
 0x2e4   :  { %v829_v49 = vadd.f32 %v1227_v46, %v1185_v39  ;;  %v1228_v50 = vpop.f32.mrb[10].mxu1 }
 0x2e5   :  { %v1229_v52 = vpop.f32.mrb[11].mxu1 }
 0x2e6   :  { %v904_v51 = vadd.f32 %v1265_v48, %v829_v49  ;;  %v1266_v53 = vpop.f32.mrb[12].mxu0  ;;  %v1230_v38 = vadd.f32 %v1229_v52, %v1228_v50 }
 0x2e7   :  { %v1267_v54 = vpop.f32.mrb[13].mxu0 }
 0x2e8   :  { %v834_v55 = vadd.f32 %v1230_v38, %v1185_v39  ;;  %v1268_v56 = vadd.f32 %v1267_v54, %v1266_v53 }
 0x2ea   :  { %v909_v57 = vadd.f32 %v1268_v56, %v834_v55 }
 0x300   :  { %v1339_v58 = vpop.f32.mrb[14].mxu0  ;;  %v1301_v59 = vpop.f32.mrb[12].mxu1 }
 0x301   :  { %v1340_v60 = vpop.f32.mrb[15].mxu0  ;;  %v1302_v61 = vpop.f32.mrb[13].mxu1 }
 0x302   :  { %v1341_v0 = vadd.f32 %v1340_v60, %v1339_v58  ;;  %v1303_v1 = vadd.f32 %v1302_v61, %v1301_v59 }
 0x304   :  { %v1342_v2 = vpop.f32.mrb[16].mxu0  ;;  %v979_v3 = vadd.f32 %v1303_v1, %v904_v51  ;;  %v1304_v4 = vpop.f32.mrb[14].mxu1 }
 0x305   :  { %v1343_v7 = vpop.f32.mrb[17].mxu0  ;;  %v1305_v8 = vpop.f32.mrb[15].mxu1 }
 0x306   :  { %v1344_v9 = vadd.f32 %v1343_v7, %v1342_v2  ;;  %v1054_v10 = vadd.f32 %v1341_v0, %v979_v3  ;;  %v1306_v11 = vadd.f32 %v1305_v8, %v1304_v4 }
 0x308   :  { %v984_v12 = vadd.f32 %v1306_v11, %v909_v57  ;;  %v1064_v13 = vmul.f32 0.2, %v1054_v10  ;;  %vm1062_vm4 = vcmp.gt.f32.partialorder %v1054_v10, 0.0 }
 0x30a   :  { %v1059_v14 = vadd.f32 %v1344_v9, %v984_v12  ;;  %v1066_v18 = vsel %vm1062_vm4, %v1054_v10, %v1064_v13 }
 0x30c   :  { %vm1063_vm5 = vcmp.gt.f32.partialorder %v1059_v14, 0.0  ;;  %v1065_v15 = vmul.f32 0.2, %v1059_v14 }
 0x30e   :  { %v1067_v19 = vsel %vm1063_vm5, %v1059_v14, %v1065_v15 }
 0x30f   :  { %v1535_v20 = vpack.c.bf16 %v1067_v19, %v1066_v18 }
 0x311   :  { %1536 = vmatpush3.bf16.xpose.msra.mxu1 %v1535_v20 }
 0x318   :  { %1364 = vmatmul.mubr.f32.vlgmr.msra.gmra.mrb[16].mxu1 %v1068_v21 }
 0x3eb   :  { %v1145_v47 = vpop.f32.mrb[16].mxu1 }
 0x3ec   :  { %v1146_v24 = vadd.f32 %v1145_v47, %v1078_v23  ;;  %v1365_v25 = vpop.f32.mrb[17].mxu1 }
 0x3ee   :  { %v1186_v26 = vmul.f32 -1.442695, %v1146_v24 }
 0x3f0   :  { %1551 = vpow2.f32 %v1186_v26 }
 0x3fa   :  { %v1552_v27 = vpop.eup %1551 }
 0x3fb   :  { %v1152_v42 = vadd.f32 1.0, %v1552_v27 }
 0x3fd   :  { %1553 = vrcp.f32 %v1152_v42 }
 0x407   :  { %v1554_v28 = vpop.eup %1553 }
 0x408   :  { %1156 = vst.msk [vmem:[#allocation11] sm:$0x1] %vm1155_vm6, %v1554_v28 }
 0x409   :  { %1654 = shalt.err (!%p1651_p8)
}
 0x40a   :  { %s1655_s0 = scalar_lea.hbm %s1936_s9, 16 }
 0x40b   :  { %p1656_p9 = scmp.ne.s32.totalorder %s1936_s9, %s1655_s0  ;;  %p1659_p10 = scmp.lt.u32.totalorder %s1655_s0, %s1936_s9 }
 0x40d   :  { %p1661_p11 = pnand %p1659_p10, %p1656_p9 }
 0x40f   :  { %1664 = shalt.err (!%p1661_p11)
}
 0x410   :  { %1166 = dma.vmem_to_hbm [thread:$0]  %s1164_s20, 16, %s1936_s9, [#allocation5]  }
 0x411   :  { %1671 = dma.done.wait [#allocation5], 16  }
 0x412   :  { %1672 = vsyncadd [#allocation5], 4294967280 }
 0x413   :  { %1170 = vsyncpa [#allocation4], 1 }
 0x414   :  { %1171 = vsyncpa [#allocation7], 1 }
 0x415   :  { %1172 = vsyncpa [#allocation10], 1 }
 0x416   :  { %1173 = vsyncpa [#allocation5], 1 }

</bundles_post_ra>
